<compile_context>
chip_gen: v6e
topology: v6e:2x2x1
jax: 0.10.0
libtpu: 0.0.40
codegen_flags: <defaults>
</compile_context>

<pallas_src>
import functools

import jax
import jax.numpy as jnp
from jax.experimental import pallas as pl
from jax.experimental.pallas import tpu as pltpu


def _vmem_limit_and_budget():
    """(vmem_limit_bytes, per-step working-set budget), tuned per chip generation."""
    cap = 128 * 1024 * 1024
    try:
        cap = int(pltpu.get_tpu_info().vmem_capacity_bytes)  # 64 MiB v7x, 128 MiB v5e/v6e
    except Exception:
        cap = 64 * 1024 * 1024                               # conservative fallback
    limit = min(cap * 3 // 4, 96 * 1024 * 1024)              # 48 MiB v7x, 96 MiB v5e/v6e
    return limit, limit // 2


def _pick_spatial_tile(hw, cin, cout, batch, budget_bytes):
    """Largest lane-dense spatial tile (multiple of 128 dividing H*W) fitting VMEM."""
    if hw % 128 != 0:
        return hw                                  # small / awkward spatial: one full block
    cands = sorted((t for t in range(128, hw + 1, 128) if hw % t == 0), reverse=True)

    def fits(t):  # double-buffered f32 activation block + bf16 output block
        return 2 * cin * t * 4 + 2 * cout * t * 2 <= budget_bytes

    fitting = [t for t in cands if fits(t)] or [cands[-1]]
    if batch < 2:  # keep >=2 parallel grid steps so the 2nd v7x TensorCore is used
        multi = [t for t in fitting if hw // t >= 2]
        if multi:
            return multi[0]
    return fitting[0]


# ----------------------------------------------------------------------------
# Fused kernel: y = W^T @ relu(x * scale + shift)   (BN + ReLU + 1x1 "deconv")
# ----------------------------------------------------------------------------
def _bn_relu_deconv1x1_kernel(x_ref, s_ref, t_ref, w_ref, o_ref):
    # Folded BatchNorm affine + ReLU in f32 (v5e has no bf16 VPU).
    h = jnp.maximum(x_ref[...] * s_ref[...] + t_ref[...], 0.0)        # (Cin, THW) f32
    # Channel GEMM on the MXU: (Cout, Cin) @ (Cin, THW), bf16 in, f32 accumulate.
    y = jnp.dot(w_ref[...], h.astype(jnp.bfloat16),
                preferred_element_type=jnp.float32)                   # (Cout, THW) f32
    o_ref[...] = y.astype(o_ref.dtype)                                # bf16 writeback


def _bn_relu_deconv1x1(x_bchw_flat, scale2d, shift2d, w_t):
    """x: (B, Cin, HW) f32; scale/shift: (Cin,1) f32; w_t: (Cout, Cin) bf16."""
    B, Cin, HW = x_bchw_flat.shape
    Cout = w_t.shape[0]

    vmem_limit, budget = _vmem_limit_and_budget()
    thw = _pick_spatial_tile(HW, Cin, Cout, B, budget)

    return pl.pallas_call(
        _bn_relu_deconv1x1_kernel,
        out_shape=jax.ShapeDtypeStruct((B, Cout, HW), jnp.bfloat16),
        grid=(B, HW // thw),
        in_specs=[
            pl.BlockSpec((None, Cin, thw), lambda b, p: (b, 0, p)),   # activations (f32)
            pl.BlockSpec((Cin, 1), lambda b, p: (0, 0)),              # BN scale
            pl.BlockSpec((Cin, 1), lambda b, p: (0, 0)),              # BN shift
            pl.BlockSpec((Cout, Cin), lambda b, p: (0, 0)),           # W^T (bf16), resident
        ],
        out_specs=pl.BlockSpec((None, Cout, thw), lambda b, p: (b, 0, p)),
        compiler_params=pltpu.CompilerParams(
            dimension_semantics=("parallel", "parallel"),
            vmem_limit_bytes=vmem_limit),
    )(x_bchw_flat, scale2d, shift2d, w_t)


# ----------------------------------------------------------------------------
# Parameters (deterministic synthetic)
# ----------------------------------------------------------------------------
def init_transition_block(key, in_planes, out_planes):
    k1, k2, k3, k4, k5 = jax.random.split(key, 5)
    gamma = 1.0 + 0.1 * jax.random.normal(k1, (in_planes,), jnp.float32)
    beta = 0.05 * jax.random.normal(k2, (in_planes,), jnp.float32)
    mean = 0.02 * jax.random.normal(k3, (in_planes,), jnp.float32)
    var = jnp.abs(1.0 + 0.1 * jax.random.normal(k4, (in_planes,), jnp.float32))
    inv = gamma * jax.lax.rsqrt(var + 1e-5)
    scale = inv
    shift = beta - mean * inv

    # ConvTranspose2d(k=1,s=1,p=0, no bias): out[o] = sum_i W[i, o] * x[i].
    # Stored pre-transposed as (Cout, Cin) bf16 (MXU-native LHS for the NCHW GEMM;
    # no Cout padding needed since Cout is a sublane dim in this layout).
    w = jax.random.normal(k5, (in_planes, out_planes), jnp.float32)
    w = w * jnp.sqrt(2.0 / in_planes)
    w_t = jnp.transpose(w).astype(jnp.bfloat16)   # (Cout, Cin)

    return {"scale": scale, "shift": shift, "w_t": w_t}


# ----------------------------------------------------------------------------
# Forward pass (matches TransitionBlock.forward semantics, NCHW in / NCHW out)
# ----------------------------------------------------------------------------
@jax.jit
def transition_block_forward(x_nchw, scale, shift, w_t):
    B, Cin, H, W = x_nchw.shape
    Cout = w_t.shape[0]
    HW = H * W

    x = x_nchw.reshape(B, Cin, HW).astype(jnp.float32)     # contiguous reshape (free)
    s = scale.astype(jnp.float32).reshape(Cin, 1)
    t = shift.astype(jnp.float32).reshape(Cin, 1)

    y = _bn_relu_deconv1x1(x, s, t, w_t)                   # (B, Cout, HW) bf16
    y = y.reshape(B, Cout, H, W)

    # F.upsample_nearest(scale_factor=2): one fused broadcast pass
    # (reads the bf16 GEMM output once, writes the final f32 NCHW tensor once).
    out = jnp.broadcast_to(
        y[:, :, :, None, :, None].astype(jnp.float32),
        (B, Cout, H, 2, W, 2)).reshape(B, Cout, 2 * H, 2 * W)
    return out


# ----------------------------------------------------------------------------
# Demo / self-check
# ----------------------------------------------------------------------------
if __name__ == "__main__":
    key = jax.random.PRNGKey(0)
    kx, kp = jax.random.split(key)

    B, in_planes, out_planes, H, W = 2, 64, 32, 16, 16
    x = jax.random.normal(kx, (B, in_planes, H, W), jnp.float32)
    params = init_transition_block(kp, in_planes, out_planes)

    out = transition_block_forward(x, params["scale"], params["shift"], params["w_t"])
    out = jax.block_until_ready(out)

    assert out.shape == (B, out_planes, 2 * H, 2 * W), out.shape
    assert bool(jnp.all(jnp.isfinite(out)))

    # Plain-JAX f32 reference (kernel uses bf16 MXU inputs + bf16 GEMM writeback).
    hr = jnp.maximum(x * params["scale"][None, :, None, None]
                     + params["shift"][None, :, None, None], 0.0)
    wr = params["w_t"].astype(jnp.float32)                 # (Cout, Cin)
    yr = jnp.einsum("oc,bchw->bohw", wr, hr)
    yr = jnp.repeat(jnp.repeat(yr, 2, axis=2), 2, axis=3)

    max_err = float(jnp.max(jnp.abs(out - yr)))
    tol = 5e-2 + 2e-2 * float(jnp.max(jnp.abs(yr)))
    assert max_err < tol, f"max abs err {max_err} vs tol {tol}"

    print("KERNEL_OK")
</pallas_src>

<mosaic_0001>
module attributes {stable_mosaic.version = 11 : i64} {
  func.func @_bn_relu_deconv1x1_kernel(%arg0: i32, %arg1: i32, %arg2: memref<1x64x256xf32, #tpu.memory_space<vmem>>, %arg3: memref<64x1xf32, #tpu.memory_space<vmem>>, %arg4: memref<64x1xf32, #tpu.memory_space<vmem>>, %arg5: memref<32x64xbf16, #tpu.memory_space<vmem>>, %arg6: memref<1x32x256xbf16, #tpu.memory_space<vmem>>) attributes {dimension_semantics = [#tpu.dimension_semantics<parallel>, #tpu.dimension_semantics<parallel>], iteration_bounds = array<i64: 2, 1>, scalar_prefetch = 0 : i64, scratch_operands = 0 : i64, tpu.core_type = #tpu.core_type<tc>, window_params = [{transform_indices = @transform_0, window_bounds = array<i64: 1, 64, 256>}, {pipeline_mode = #tpu.pipeline_mode<synchronous>, transform_indices = @transform_1, window_bounds = array<i64: 64, 1>}, {pipeline_mode = #tpu.pipeline_mode<synchronous>, transform_indices = @transform_2, window_bounds = array<i64: 64, 1>}, {pipeline_mode = #tpu.pipeline_mode<synchronous>, transform_indices = @transform_3, window_bounds = array<i64: 32, 64>}, {transform_indices = @transform_4, window_bounds = array<i64: 1, 32, 256>}]} {
    %c0 = arith.constant 0 : index
    %c0_0 = arith.constant 0 : index
    %c0_1 = arith.constant 0 : index
    %0 = vector.load %arg2[%c0, %c0_0, %c0_1] : memref<1x64x256xf32, #tpu.memory_space<vmem>>, vector<1x64x256xf32>
    %1 = vector.shape_cast %0 : vector<1x64x256xf32> to vector<64x256xf32>
    %c0_2 = arith.constant 0 : index
    %c0_3 = arith.constant 0 : index
    %2 = vector.load %arg3[%c0_2, %c0_3] : memref<64x1xf32, #tpu.memory_space<vmem>>, vector<64x1xf32>
    %3 = vector.broadcast %2 : vector<64x1xf32> to vector<64x256xf32>
    %4 = arith.mulf %1, %3 : vector<64x256xf32>
    %c0_4 = arith.constant 0 : index
    %c0_5 = arith.constant 0 : index
    %5 = vector.load %arg4[%c0_4, %c0_5] : memref<64x1xf32, #tpu.memory_space<vmem>>, vector<64x1xf32>
    %6 = vector.broadcast %5 : vector<64x1xf32> to vector<64x256xf32>
    %7 = arith.addf %4, %6 : vector<64x256xf32>
    %cst = arith.constant 0.000000e+00 : f32
    %8 = vector.broadcast %cst : f32 to vector<64x256xf32>
    %9 = arith.maximumf %7, %8 : vector<64x256xf32>
    %c0_6 = arith.constant 0 : index
    %c0_7 = arith.constant 0 : index
    %10 = vector.load %arg5[%c0_6, %c0_7] : memref<32x64xbf16, #tpu.memory_space<vmem>>, vector<32x64xbf16>
    %11 = arith.truncf %9 : vector<64x256xf32> to vector<64x256xbf16>
    %cst_8 = arith.constant dense<0.000000e+00> : vector<32x256xf32>
    %12 = tpu.matmul %10, %11, %cst_8 {dimension_numbers = #tpu.dot_dimension_numbers<[1], [0], [0], [1], [0, 0, 1, 1], [], []>} : vector<32x64xbf16>, vector<64x256xbf16>, vector<32x256xf32> -> vector<32x256xf32>
    %13 = arith.truncf %12 : vector<32x256xf32> to vector<32x256xbf16>
    %c0_9 = arith.constant 0 : index
    %c0_10 = arith.constant 0 : index
    %c0_11 = arith.constant 0 : index
    %14 = vector.load %arg6[%c0_9, %c0_10, %c0_11] : memref<1x32x256xbf16, #tpu.memory_space<vmem>>, vector<1x32x256xbf16>
    %15 = vector.shape_cast %14 : vector<1x32x256xbf16> to vector<32x256xbf16>
    %16 = vector.shape_cast %13 : vector<32x256xbf16> to vector<1x32x256xbf16>
    tpu.vector_store %arg6[%c0_9, %c0_10, %c0_11], %16 {strides = array<i32>} : memref<1x32x256xbf16, #tpu.memory_space<vmem>>, vector<1x32x256xbf16>,
    return
  }
  func.func @transform_0(%arg0: i32, %arg1: i32) -> (i32, i32, i32) {
    %c0_i32 = arith.constant 0 : i32
    %c0_i32_0 = arith.constant 0 : i32
    return %arg0, %c0_i32, %arg1 : i32, i32, i32
  }
  func.func @transform_1(%arg0: i32, %arg1: i32) -> (i32, i32) {
    %c0_i32 = arith.constant 0 : i32
    %c0_i32_0 = arith.constant 0 : i32
    %c0_i32_1 = arith.constant 0 : i32
    return %c0_i32, %c0_i32_0 : i32, i32
  }
  func.func @transform_2(%arg0: i32, %arg1: i32) -> (i32, i32) {
    %c0_i32 = arith.constant 0 : i32
    %c0_i32_0 = arith.constant 0 : i32
    %c0_i32_1 = arith.constant 0 : i32
    return %c0_i32, %c0_i32_0 : i32, i32
  }
  func.func @transform_3(%arg0: i32, %arg1: i32) -> (i32, i32) {
    %c0_i32 = arith.constant 0 : i32
    %c0_i32_0 = arith.constant 0 : i32
    %c0_i32_1 = arith.constant 0 : i32
    return %c0_i32, %c0_i32_0 : i32, i32
  }
  func.func @transform_4(%arg0: i32, %arg1: i32) -> (i32, i32, i32) {
    %c0_i32 = arith.constant 0 : i32
    %c0_i32_0 = arith.constant 0 : i32
    return %arg0, %c0_i32, %arg1 : i32, i32, i32
  }
}

</mosaic_0001>

<bundles_post_ra>
// kernel: transition_block_forward.1
= control target key start
LH: loop header
LB: loop body
LE: loop exit
PB: predicated region body
PF: predicated region fallthrough
CT: control target
= control target key end

     0   :  { %s707_s15 = smov 0   ;;  %s709_s16 = smov 0   ;;  %s820_s0 = inlined_call_operand.vmem [shape: f32[2,64,256], index: 0, kind: input, shape index: {}]   ;;  %s821_s1 = inlined_call_operand.vmem [shape: f32[64,1], index: 1, kind: input, shape index: {}]   ;;  %s822_s2 = inlined_call_operand.vmem [shape: f32[64,1], index: 2, kind: input, shape index: {}]   ;;  %s823_s3 = inlined_call_operand.vmem [shape: bf16[32,64], index: 3, kind: input, shape index: {}]   ;;  %s824_s4 = inlined_call_operand.vmem [shape: bf16[2,32,256], index: 4, kind: output, shape index: {}]  }
   0x1   :  { %s711_s17 = smov 0  }
   0x2 LB: > { %s26_s18 = sadd.s32 1, %s675_s16  ;;  %p599_p0 = scmp.ge.s32.totalorder %s679_s17, 1  ;;  %s679_s17 = sphi %s711_s17, %s14_s17   ;;  %s675_s16 = sphi %s709_s16, %s826_s16   ;;  %s671_s15 = sphi %s707_s15, %s825_s15  }
   0x3   : > { %p28_p1 = scmp.ge.s32.totalorder %s26_s18, 2  ;;  %p183_p2 = scmp.lt.s32.totalorder %s679_s17, 3 }
   0x5   : > { %s828_s18 = smov (%p28_p1, %s26_s18), 0  ;;  %p184_p3 = pnand %p599_p0, %p183_p2 }
   0x6   : > { %p218_p4 = scmp.lt.s32.totalorder (!%p184_p3), %s671_s15, 1 }
   0x7   : > { %187 = sbr.rel (%p184_p3) target bundleno = 378 (0x17a), region = 36 }
   0xc   : > { %v324_v0 = vld [vmem:[%s822_s2 + $0x30] sm:$0xff]  ;;  %v681_v2 = vmov 0   ;;  %v325_v3 = vld [vmem:[%s822_s2 + $0x38] sm:$0xff]  ;;  %v259_v5 = vld [vmem:[%s821_s1 + $0x28] sm:$0xff]  ;;  %s830_s15 = smov (!%p218_p4, %s671_s15), 1  ;;  %vm420_vm0 = vcmask 523264  }
   0xd   : > { %v260_v1 = vld [vmem:[%s821_s1 + $0x30] sm:$0xff]  ;;  %654 = vset.pattern.permute.xlu1 %v681_v2  ;;  %653 = vset.pattern.permute.xlu0 %v681_v2  ;;  %v261_v4 = vld [vmem:[%s821_s1 + $0x38] sm:$0xff]  ;;  %v258_v6 = vld [vmem:[%s821_s1 + $0x20] sm:$0xff]  ;;  %s614_s29 = sshll.u32 %s830_s15, 7  ;;  %s615_s11 = sshll.u32 %s830_s15, 5 }
   0xe   : > { %358 = vperm.xlu1 %654, %v324_v0   ;;  %294 = vperm.xlu0 %653, %v260_v1   ;;  %v323_v7 = vld [vmem:[%s822_s2 + $0x28] sm:$0xff]  ;;  %v322_v8 = vld [vmem:[%s822_s2 + $0x20] sm:$0xff]  ;;  %v257_v9 = vld [vmem:[%s821_s1 + $0x18] sm:$0xff]  ;;  %s783_s6 = scalar_lea.vmem %s820_s0, %s614_s29  ;;  %s235_s14 = scalar_lea.vmem %s824_s4, %s615_s11 }
   0xf   : > { %459 = vmatprep.mubr.bf16.mxu0 %v681_v2  ;;  %469 = vmatprep.mubr.bf16.mxu1 %v681_v2  ;;  %v256_v10 = vld [vmem:[%s821_s1 + $0x10] sm:$0xff]  ;;  %v321_v11 = vld [vmem:[%s822_s2 + $0x18] sm:$0xff]  ;;  %v255_v13 = vld [vmem:[%s821_s1 + $0x8] sm:$0xff] }
  0x10   : > { %v320_v12 = vld [vmem:[%s822_s2 + $0x10] sm:$0xff]  ;;  %v254_v14 = vld [vmem:[%s821_s1] sm:$0xff]  ;;  %v319_v15 = vld [vmem:[%s822_s2 + $0x8] sm:$0xff] }
  0x11   : > { %v318_v16 = vld [vmem:[%s822_s2] sm:$0xff]  ;;  %v251_v18 = vld [vmem:[%s783_s6 + $0x68] sm:$0xff]  ;;  %v252_v23 = vld [vmem:[%s783_s6 + $0x70] sm:$0xff] }
  0x12   : > { %363 = vperm.xlu1 %654, %v325_v3   ;;  %299 = vperm.xlu0 %653, %v261_v4   ;;  %v250_v17 = vld [vmem:[%s783_s6 + $0x60] sm:$0xff]  ;;  %v253_v24 = vld [vmem:[%s783_s6 + $0x78] sm:$0xff]  ;;  %v248_v33 = vld [vmem:[%s783_s6 + $0x50] sm:$0xff] }
  0x13   : > { %v249_v35 = vld [vmem:[%s783_s6 + $0x58] sm:$0xff]  ;;  %v246_v37 = vld [vmem:[%s783_s6 + $0x40] sm:$0xff]  ;;  %v247_v38 = vld [vmem:[%s783_s6 + $0x48] sm:$0xff] }
  0x14   : > { %v244_v59 = vld [vmem:[%s783_s6 + $0x30] sm:$0xff]  ;;  %v245_v61 = vld [vmem:[%s783_s6 + $0x38] sm:$0xff]  ;;  %v242_v63 = vld [vmem:[%s783_s6 + $0x20] sm:$0xff] }
  0x15   : > { %v243_v0 = vld [vmem:[%s783_s6 + $0x28] sm:$0xff] }
  0x16   : > { %289 = vperm.xlu1 %654, %v259_v5   ;;  %284 = vperm.xlu0 %653, %v258_v6  }
  0x1a   : > { %353 = vperm.xlu1 %654, %v323_v7   ;;  %348 = vperm.xlu0 %653, %v322_v8  }
  0x1e   : > { %279 = vperm.xlu1 %654, %v257_v9   ;;  %274 = vperm.xlu0 %653, %v256_v10  }
  0x22   : > { %343 = vperm.xlu1 %654, %v321_v11   ;;  %338 = vperm.xlu0 %653, %v320_v12  }
  0x26   : > { %269 = vperm.xlu1 %654, %v255_v13   ;;  %264 = vperm.xlu0 %653, %v254_v14  }
  0x2a   : > { %333 = vperm.xlu1 %654, %v319_v15   ;;  %328 = vperm.xlu0 %653, %v318_v16  }
  0x89   : > { %v359_v19 = vpop.permute.xlu1 %358  ;;  %v295_v20 = vpop.permute.xlu0 %294 }
  0x8a   : > { %v314_v21 = vmul.f32 %v295_v20, %v250_v17  ;;  %v315_v22 = vmul.f32 %v295_v20, %v251_v18  ;;  %v240_v17 = vld [vmem:[%s783_s6 + $0x10] sm:$0xff] }
  0x8c   : > { %v378_v29 = vadd.f32 %v359_v19, %v314_v21  ;;  %v379_v30 = vadd.f32 %v359_v19, %v315_v22  ;;  %v241_v19 = vld [vmem:[%s783_s6 + $0x18] sm:$0xff]  ;;  %v238_v21 = vld [vmem:[%s783_s6] sm:$0xff]  ;;  %v239_v22 = vld [vmem:[%s783_s6 + $0x8] sm:$0xff] }
  0x8d   : > { %v364_v25 = vpop.permute.xlu1 %363  ;;  %v300_v26 = vpop.permute.xlu0 %299 }
  0x8e   : > { %v316_v27 = vmul.f32 %v300_v26, %v252_v23  ;;  %v317_v28 = vmul.f32 %v300_v26, %v253_v24  ;;  %v395_v39 = vmax.f32 %v379_v30, 0.0  ;;  %v394_v41 = vmax.f32 %v378_v29, 0.0 }
  0x90   : > { %v380_v31 = vadd.f32 %v364_v25, %v316_v27  ;;  %v381_v32 = vadd.f32 %v364_v25, %v317_v28 }
  0x91   : > { %v290_v34 = vpop.permute.xlu1 %289  ;;  %v285_v36 = vpop.permute.xlu0 %284 }
  0x92   : > { %v397_v40 = vmax.f32 %v381_v32, 0.0  ;;  %v396_v42 = vmax.f32 %v380_v31, 0.0  ;;  %v312_v43 = vmul.f32 %v290_v34, %v248_v33  ;;  %v313_v44 = vmul.f32 %v290_v34, %v249_v35 }
  0x93   : > { %v310_v45 = vmul.f32 %v285_v36, %v246_v37  ;;  %v311_v46 = vmul.f32 %v285_v36, %v247_v38 }
  0x94   : > { %v409_v49 = vpack.c.bf16 %v397_v40, %v395_v39  ;;  %v408_v50 = vpack.c.bf16 %v396_v42, %v394_v41  ;;  %v655_v41 = vld [vmem:[%s823_s3] sm:$0xff]   ;;  %v656_v42 = vld [vmem:[%s823_s3 + $0x8] sm:$0xff]  }
  0x95   : > { %v354_v47 = vpop.permute.xlu1 %353  ;;  %v349_v48 = vpop.permute.xlu0 %348 }
  0x96   : > { %v376_v51 = vadd.f32 %v354_v47, %v312_v43  ;;  %v377_v52 = vadd.f32 %v354_v47, %v313_v44  ;;  %v374_v53 = vadd.f32 %v349_v48, %v310_v45  ;;  %v375_v54 = vadd.f32 %v349_v48, %v311_v46  ;;  %435 = vmatprep.subr.bf16.mxu0 %v409_v49 }
  0x97   : > { %620 = vmatprep.subr.bf16.mxu1 %v409_v49  ;;  %436 = vmatpush1.bf16.msra.mxu0 %v408_v50 }
  0x98   : > { %v392_v55 = vmax.f32 %v376_v51, 0.0  ;;  %v393_v56 = vmax.f32 %v377_v52, 0.0  ;;  %v390_v57 = vmax.f32 %v374_v53, 0.0  ;;  %v391_v58 = vmax.f32 %v375_v54, 0.0  ;;  %624 = vmatpush1.bf16.msra.mxu1 %v408_v50 }
  0x99   : > { %v280_v60 = vpop.permute.xlu1 %279  ;;  %v275_v62 = vpop.permute.xlu0 %274 }
  0x9a   : > { %v407_v1 = vpack.c.bf16 %v393_v56, %v391_v58  ;;  %v406_v2 = vpack.c.bf16 %v392_v55, %v390_v57  ;;  %v308_v3 = vmul.f32 %v280_v60, %v244_v59  ;;  %v309_v4 = vmul.f32 %v280_v60, %v245_v61 }
  0x9b   : > { %v306_v5 = vmul.f32 %v275_v62, %v242_v63  ;;  %v307_v6 = vmul.f32 %v275_v62, %v243_v0 }
  0x9c   : > { %437 = vmatprep.subr.bf16.mxu0 %v407_v1  ;;  %621 = vmatprep.subr.bf16.mxu1 %v407_v1 }
  0x9d   : > { %v344_v7 = vpop.permute.xlu1 %343  ;;  %v339_v8 = vpop.permute.xlu0 %338  ;;  %438 = vmatpush1.bf16.msra.mxu0 %v406_v2  ;;  %625 = vmatpush1.bf16.msra.mxu1 %v406_v2 }
  0x9e   : > { %v372_v9 = vadd.f32 %v344_v7, %v308_v3  ;;  %v373_v10 = vadd.f32 %v344_v7, %v309_v4  ;;  %v370_v11 = vadd.f32 %v339_v8, %v306_v5  ;;  %v371_v12 = vadd.f32 %v339_v8, %v307_v6 }
  0xa0   : > { %v388_v13 = vmax.f32 %v372_v9, 0.0  ;;  %v389_v14 = vmax.f32 %v373_v10, 0.0  ;;  %v386_v15 = vmax.f32 %v370_v11, 0.0  ;;  %v387_v16 = vmax.f32 %v371_v12, 0.0 }
  0xa1   : > { %v270_v18 = vpop.permute.xlu1 %269  ;;  %v265_v20 = vpop.permute.xlu0 %264 }
  0xa2   : > { %v405_v23 = vpack.c.bf16 %v389_v14, %v387_v16  ;;  %v404_v24 = vpack.c.bf16 %v388_v13, %v386_v15  ;;  %v304_v25 = vmul.f32 %v270_v18, %v240_v17  ;;  %v305_v26 = vmul.f32 %v270_v18, %v241_v19 }
  0xa3   : > { %v302_v27 = vmul.f32 %v265_v20, %v238_v21  ;;  %v303_v28 = vmul.f32 %v265_v20, %v239_v22 }
  0xa4   : > { %439 = vmatprep.subr.bf16.mxu0 %v405_v23  ;;  %622 = vmatprep.subr.bf16.mxu1 %v405_v23 }
  0xa5   : > { %v334_v29 = vpop.permute.xlu1 %333  ;;  %v329_v30 = vpop.permute.xlu0 %328  ;;  %440 = vmatpush1.bf16.msra.mxu0 %v404_v24  ;;  %626 = vmatpush1.bf16.msra.mxu1 %v404_v24 }
  0xa6   : > { %v368_v31 = vadd.f32 %v334_v29, %v304_v25  ;;  %v369_v32 = vadd.f32 %v334_v29, %v305_v26  ;;  %v366_v33 = vadd.f32 %v329_v30, %v302_v27  ;;  %v367_v34 = vadd.f32 %v329_v30, %v303_v28 }
  0xa8   : > { %v384_v35 = vmax.f32 %v368_v31, 0.0  ;;  %v385_v36 = vmax.f32 %v369_v32, 0.0  ;;  %v382_v37 = vmax.f32 %v366_v33, 0.0  ;;  %v383_v38 = vmax.f32 %v367_v34, 0.0 }
  0xaa   : > { %v402_v39 = vpack.c.bf16 %v384_v35, %v382_v37  ;;  %v403_v40 = vpack.c.bf16 %v385_v36, %v383_v38 }
  0xac   : > { %441 = vmatprep.subr.bf16.mxu0 %v403_v40  ;;  %623 = vmatprep.subr.bf16.mxu1 %v403_v40 }
  0xad   : > { %442 = vmatpush1.bf16.msra.mxu0 %v402_v39  ;;  %627 = vmatpush1.bf16.msra.mxu1 %v402_v39 }
  0xb0   : > { %606 = vmatmul.mubr.msk.bf16.vlgmr.msra.gmra.mxu0 %vm420_vm0, %v655_v41  ;;  %607 = vmatmul.mubr.msk.bf16.vlgmr.msra.gmra.mxu1 %vm420_vm0, %v656_v42 }
 0x170   : > { %v461_v43 = vpop.f32.mrf.mxu0  ;;  %v471_v44 = vpop.f32.mrf.mxu1 }
 0x172   : > { %v463_v45 = vpop.f32.mrf.mxu0  ;;  %v473_v46 = vpop.f32.mrf.mxu1 }
 0x173   : > { %v616_v47 = vpack.c.bf16 %v463_v45, %v461_v43  ;;  %v618_v48 = vpack.c.bf16 %v473_v46, %v471_v44 }
 0x174   : > { %v465_v49 = vpop.f32.mrf.mxu0  ;;  %v475_v50 = vpop.f32.mrf.mxu1 }
 0x175   : > { %504 = vst [vmem:[%s235_s14] sm:$0xff] %v616_v47  ;;  %506 = vst [vmem:[%s235_s14 + $0x10] sm:$0xff] %v618_v48 }
 0x176   : > { %v467_v51 = vpop.f32.mrf.mxu0  ;;  %v477_v52 = vpop.f32.mrf.mxu1 }
 0x177   : > { %v617_v53 = vpack.c.bf16 %v467_v51, %v465_v49  ;;  %v619_v54 = vpack.c.bf16 %v477_v52, %v475_v50 }
 0x179   : > { %505 = vst [vmem:[%s235_s14 + $0x8] sm:$0xff] %v617_v53  ;;  %507 = vst [vmem:[%s235_s14 + $0x18] sm:$0xff] %v619_v54 }
 0x17a PF: > { %s14_s17 = sadd.s32 1, %s679_s17   ;;  %s825_s15 = smov %s675_s16 }
 0x17b   : > { %p11_p5 = scmp.ge.s32.totalorder %s14_s17, 4   ;;  %s826_s16 = smov %s828_s18 }
 0x17d   :  { %13 = sbr.rel (!%p11_p5) target bundleno = 2 (0x2), region = 66 }

</bundles_post_ra>
